<compile_context>
chip_gen: v6e
topology: v6e:2x2x1
jax: 0.10.0
libtpu: 0.0.40
codegen_flags: <defaults>
</compile_context>

<pallas_src>
import functools

import jax
import jax.numpy as jnp
from jax.experimental import pallas as pl
from jax.experimental.pallas import tpu as pltpu

D_IN = 28 * 28            # 784
D_IN_PAD = 896            # 7 * 128  (zero-padded K for layer 1)
H1, H2 = 256, 128
H3, H3_PAD = 64, 128      # pad 64 -> 128 (lane-dense hidden)
D_OUT, D_OUT_PAD = 10, 128  # pad 10 -> 128 (unmasked lane-dense output stores)


def _round_up(x, m):
    return (x + m - 1) // m * m


def _mlp_kernel(x_ref, w1_ref, b1_ref, w2_ref, b2_ref, w3_ref, b3_ref,
                w4_ref, b4_ref, o_ref):
    # Fully fused 4-layer MLP. Matmul inputs are bf16 (native MXU rate);
    # accumulation / bias add / ReLU stay in f32.
    h = jnp.dot(x_ref[...], w1_ref[...], preferred_element_type=jnp.float32)
    h = jnp.maximum(h + b1_ref[...], 0.0)
    h = jnp.dot(h.astype(w2_ref.dtype), w2_ref[...],
                preferred_element_type=jnp.float32)
    h = jnp.maximum(h + b2_ref[...], 0.0)
    h = jnp.dot(h.astype(w3_ref.dtype), w3_ref[...],
                preferred_element_type=jnp.float32)
    h = jnp.maximum(h + b3_ref[...], 0.0)
    out = jnp.dot(h.astype(w4_ref.dtype), w4_ref[...],
                  preferred_element_type=jnp.float32)
    o_ref[...] = (out + b4_ref[...]).astype(o_ref.dtype)


@functools.partial(jax.jit, static_argnames=("block_b",))
def mlp_forward(x, params, block_b=256):
    """x: (B, 1, 28, 28) float32 -> logits (B, 10) float32."""
    B = x.shape[0]
    (w1, b1), (w2, b2), (w3, b3), (w4, b4) = params

    # ---- wrapper-side layout prep: flatten, zero-pad, cast to bf16 -----------
    x2d = x.reshape(B, D_IN).astype(jnp.float32)                 # nn.Flatten
    x2d = jnp.pad(x2d, ((0, 0), (0, D_IN_PAD - D_IN)))           # K: 784 -> 896

    # Batch tile: big enough to fill MXU rows for large B, but never larger
    # than the (8-rounded) batch so tiny batches are one clean block.
    bb = min(block_b, _round_up(B, 8))
    B_pad = _round_up(B, bb)
    if B_pad != B:
        x2d = jnp.pad(x2d, ((0, B_pad - B), (0, 0)))             # padded rows discarded
    x_bf = x2d.astype(jnp.bfloat16)

    # Lane-aligned, (in, out)-layout weights in bf16; biases in f32.
    w1p = jnp.pad(w1, ((0, D_IN_PAD - D_IN), (0, 0))).astype(jnp.bfloat16)              # (896, 256)
    w2p = w2.astype(jnp.bfloat16)                                                        # (256, 128)
    w3p = jnp.pad(w3, ((0, 0), (0, H3_PAD - H3))).astype(jnp.bfloat16)                   # (128, 128)
    w4p = jnp.pad(w4, ((0, H3_PAD - H3), (0, D_OUT_PAD - D_OUT))).astype(jnp.bfloat16)   # (128, 128)
    b1p = b1.astype(jnp.float32)                                                         # (1, 256)
    b2p = b2.astype(jnp.float32)                                                         # (1, 128)
    b3p = jnp.pad(b3, ((0, 0), (0, H3_PAD - H3))).astype(jnp.float32)                    # (1, 128)
    b4p = jnp.pad(b4, ((0, 0), (0, D_OUT_PAD - D_OUT))).astype(jnp.float32)              # (1, 128)

    grid = (B_pad // bb,)

    def full_spec(shape):
        # Whole-array block, replicated across the batch grid axis.
        return pl.BlockSpec(shape, lambda i: (0,) * len(shape))

    out_pad = pl.pallas_call(
        _mlp_kernel,
        out_shape=jax.ShapeDtypeStruct((B_pad, D_OUT_PAD), jnp.float32),
        grid_spec=pltpu.PrefetchScalarGridSpec(
            num_scalar_prefetch=0,
            grid=grid,
            in_specs=[
                pl.BlockSpec((bb, D_IN_PAD), lambda i: (i, 0)),   # x tile
                full_spec(w1p.shape), full_spec(b1p.shape),
                full_spec(w2p.shape), full_spec(b2p.shape),
                full_spec(w3p.shape), full_spec(b3p.shape),
                full_spec(w4p.shape), full_spec(b4p.shape),
            ],
            out_specs=pl.BlockSpec((bb, D_OUT_PAD), lambda i: (i, 0)),
        ),
        compiler_params=pltpu.CompilerParams(
            dimension_semantics=("parallel",)),
    )(x_bf, w1p, b1p, w2p, b2p, w3p, b3p, w4p, b4p)

    return out_pad[:B, :D_OUT]


def init_params(key):
    """Deterministic init matching PyTorch nn.Linear default (U(-1/sqrt(fan_in), +))."""
    dims = [(D_IN, H1), (H1, H2), (H2, H3), (H3, D_OUT)]
    params = []
    for (fan_in, fan_out) in dims:
        key, kw, kb = jax.random.split(key, 3)
        bound = 1.0 / jnp.sqrt(fan_in)
        # stored as (in, out) == W.T so kernel does x @ w
        w = jax.random.uniform(kw, (fan_in, fan_out), jnp.float32, -bound, bound)
        b = jax.random.uniform(kb, (1, fan_out), jnp.float32, -bound, bound)
        params.append((w, b))
    return params


def ref_forward(x, params, bf16):
    """Plain-JAX reference. bf16=True mirrors the kernel's mixed precision."""
    h = x.reshape(x.shape[0], -1).astype(jnp.float32)
    for i, (w, b) in enumerate(params):
        if bf16:
            h = jnp.dot(h.astype(jnp.bfloat16), w.astype(jnp.bfloat16),
                        preferred_element_type=jnp.float32) + b
        else:
            h = jnp.dot(h, w, preferred_element_type=jnp.float32) + b
        if i < 3:
            h = jnp.maximum(h, 0.0)
    return h


if __name__ == "__main__":
    key = jax.random.PRNGKey(0)
    kx, kp = jax.random.split(key)

    B = 8
    x = jax.random.normal(kx, (B, 1, 28, 28), jnp.float32)
    params = init_params(kp)

    out = jax.block_until_ready(mlp_forward(x, params))
    assert out.shape == (B, 10)

    # Same bf16-input / f32-accumulate math -> tight match.
    ref_b = ref_forward(x, params, bf16=True)
    assert jnp.allclose(out, ref_b, atol=1e-3, rtol=1e-3), \
        float(jnp.max(jnp.abs(out - ref_b)))

    # Full-f32 reference -> loose sanity (bf16 matmul inputs deviate slightly).
    ref_f = ref_forward(x, params, bf16=False)
    assert jnp.allclose(out, ref_f, atol=2e-1, rtol=2e-1)

    # Exercise the multi-block grid path on a still-small batch.
    B2 = 24
    x2 = jax.random.normal(kx, (B2, 1, 28, 28), jnp.float32)
    out2 = jax.block_until_ready(mlp_forward(x2, params, block_b=8))
    assert out2.shape == (B2, 10)
    assert jnp.allclose(out2, ref_forward(x2, params, bf16=True),
                        atol=1e-3, rtol=1e-3)

    print("KERNEL_OK")
</pallas_src>

<mosaic_0001>
module attributes {stable_mosaic.version = 11 : i64} {
  func.func @_mlp_kernel(%arg0: i32, %arg1: memref<8x896xbf16, #tpu.memory_space<vmem>>, %arg2: memref<896x256xbf16, #tpu.memory_space<vmem>>, %arg3: memref<1x256xf32, #tpu.memory_space<vmem>>, %arg4: memref<256x128xbf16, #tpu.memory_space<vmem>>, %arg5: memref<1x128xf32, #tpu.memory_space<vmem>>, %arg6: memref<128x128xbf16, #tpu.memory_space<vmem>>, %arg7: memref<1x128xf32, #tpu.memory_space<vmem>>, %arg8: memref<128x128xbf16, #tpu.memory_space<vmem>>, %arg9: memref<1x128xf32, #tpu.memory_space<vmem>>, %arg10: memref<8x128xf32, #tpu.memory_space<vmem>>) attributes {dimension_semantics = [#tpu.dimension_semantics<parallel>], iteration_bounds = array<i64: 1>, scalar_prefetch = 0 : i64, scratch_operands = 0 : i64, tpu.core_type = #tpu.core_type<tc>, window_params = [{transform_indices = @transform_0, window_bounds = array<i64: 8, 896>}, {pipeline_mode = #tpu.pipeline_mode<synchronous>, transform_indices = @transform_1, window_bounds = array<i64: 896, 256>}, {pipeline_mode = #tpu.pipeline_mode<synchronous>, transform_indices = @transform_2, window_bounds = array<i64: 1, 256>}, {pipeline_mode = #tpu.pipeline_mode<synchronous>, transform_indices = @transform_3, window_bounds = array<i64: 256, 128>}, {pipeline_mode = #tpu.pipeline_mode<synchronous>, transform_indices = @transform_4, window_bounds = array<i64: 1, 128>}, {pipeline_mode = #tpu.pipeline_mode<synchronous>, transform_indices = @transform_5, window_bounds = array<i64: 128, 128>}, {pipeline_mode = #tpu.pipeline_mode<synchronous>, transform_indices = @transform_6, window_bounds = array<i64: 1, 128>}, {pipeline_mode = #tpu.pipeline_mode<synchronous>, transform_indices = @transform_7, window_bounds = array<i64: 128, 128>}, {pipeline_mode = #tpu.pipeline_mode<synchronous>, transform_indices = @transform_8, window_bounds = array<i64: 1, 128>}, {transform_indices = @transform_9, window_bounds = array<i64: 8, 128>}]} {
    %c0 = arith.constant 0 : index
    %c0_0 = arith.constant 0 : index
    %0 = vector.load %arg1[%c0, %c0_0] : memref<8x896xbf16, #tpu.memory_space<vmem>>, vector<8x896xbf16>
    %c0_1 = arith.constant 0 : index
    %c0_2 = arith.constant 0 : index
    %1 = vector.load %arg2[%c0_1, %c0_2] : memref<896x256xbf16, #tpu.memory_space<vmem>>, vector<896x256xbf16>
    %cst = arith.constant dense<0.000000e+00> : vector<8x256xf32>
    %2 = tpu.matmul %0, %1, %cst {dimension_numbers = #tpu.dot_dimension_numbers<[1], [0], [0], [1], [0, 0, 1, 1], [], []>} : vector<8x896xbf16>, vector<896x256xbf16>, vector<8x256xf32> -> vector<8x256xf32>
    %c0_3 = arith.constant 0 : index
    %c0_4 = arith.constant 0 : index
    %3 = vector.load %arg3[%c0_3, %c0_4] : memref<1x256xf32, #tpu.memory_space<vmem>>, vector<1x256xf32>
    %4 = vector.broadcast %3 : vector<1x256xf32> to vector<8x256xf32>
    %5 = arith.addf %2, %4 : vector<8x256xf32>
    %cst_5 = arith.constant 0.000000e+00 : f32
    %6 = vector.broadcast %cst_5 : f32 to vector<8x256xf32>
    %7 = arith.maximumf %5, %6 : vector<8x256xf32>
    %8 = arith.truncf %7 : vector<8x256xf32> to vector<8x256xbf16>
    %c0_6 = arith.constant 0 : index
    %c0_7 = arith.constant 0 : index
    %9 = vector.load %arg4[%c0_6, %c0_7] : memref<256x128xbf16, #tpu.memory_space<vmem>>, vector<256x128xbf16>
    %cst_8 = arith.constant dense<0.000000e+00> : vector<8x128xf32>
    %10 = tpu.matmul %8, %9, %cst_8 {dimension_numbers = #tpu.dot_dimension_numbers<[1], [0], [0], [1], [0, 0, 1, 1], [], []>} : vector<8x256xbf16>, vector<256x128xbf16>, vector<8x128xf32> -> vector<8x128xf32>
    %c0_9 = arith.constant 0 : index
    %c0_10 = arith.constant 0 : index
    %11 = vector.load %arg5[%c0_9, %c0_10] : memref<1x128xf32, #tpu.memory_space<vmem>>, vector<1x128xf32>
    %12 = vector.broadcast %11 : vector<1x128xf32> to vector<8x128xf32>
    %13 = arith.addf %10, %12 : vector<8x128xf32>
    %cst_11 = arith.constant 0.000000e+00 : f32
    %14 = vector.broadcast %cst_11 : f32 to vector<8x128xf32>
    %15 = arith.maximumf %13, %14 : vector<8x128xf32>
    %16 = arith.truncf %15 : vector<8x128xf32> to vector<8x128xbf16>
    %c0_12 = arith.constant 0 : index
    %c0_13 = arith.constant 0 : index
    %17 = vector.load %arg6[%c0_12, %c0_13] : memref<128x128xbf16, #tpu.memory_space<vmem>>, vector<128x128xbf16>
    %cst_14 = arith.constant dense<0.000000e+00> : vector<8x128xf32>
    %18 = tpu.matmul %16, %17, %cst_14 {dimension_numbers = #tpu.dot_dimension_numbers<[1], [0], [0], [1], [0, 0, 1, 1], [], []>} : vector<8x128xbf16>, vector<128x128xbf16>, vector<8x128xf32> -> vector<8x128xf32>
    %c0_15 = arith.constant 0 : index
    %c0_16 = arith.constant 0 : index
    %19 = vector.load %arg7[%c0_15, %c0_16] : memref<1x128xf32, #tpu.memory_space<vmem>>, vector<1x128xf32>
    %20 = vector.broadcast %19 : vector<1x128xf32> to vector<8x128xf32>
    %21 = arith.addf %18, %20 : vector<8x128xf32>
    %cst_17 = arith.constant 0.000000e+00 : f32
    %22 = vector.broadcast %cst_17 : f32 to vector<8x128xf32>
    %23 = arith.maximumf %21, %22 : vector<8x128xf32>
    %24 = arith.truncf %23 : vector<8x128xf32> to vector<8x128xbf16>
    %c0_18 = arith.constant 0 : index
    %c0_19 = arith.constant 0 : index
    %25 = vector.load %arg8[%c0_18, %c0_19] : memref<128x128xbf16, #tpu.memory_space<vmem>>, vector<128x128xbf16>
    %cst_20 = arith.constant dense<0.000000e+00> : vector<8x128xf32>
    %26 = tpu.matmul %24, %25, %cst_20 {dimension_numbers = #tpu.dot_dimension_numbers<[1], [0], [0], [1], [0, 0, 1, 1], [], []>} : vector<8x128xbf16>, vector<128x128xbf16>, vector<8x128xf32> -> vector<8x128xf32>
    %c0_21 = arith.constant 0 : index
    %c0_22 = arith.constant 0 : index
    %27 = vector.load %arg9[%c0_21, %c0_22] : memref<1x128xf32, #tpu.memory_space<vmem>>, vector<1x128xf32>
    %28 = vector.broadcast %27 : vector<1x128xf32> to vector<8x128xf32>
    %29 = arith.addf %26, %28 : vector<8x128xf32>
    %c0_23 = arith.constant 0 : index
    %c0_24 = arith.constant 0 : index
    %30 = vector.load %arg10[%c0_23, %c0_24] : memref<8x128xf32, #tpu.memory_space<vmem>>, vector<8x128xf32>
    tpu.vector_store %arg10[%c0_23, %c0_24], %29 {strides = array<i32>} : memref<8x128xf32, #tpu.memory_space<vmem>>, vector<8x128xf32>,
    return
  }
  func.func @transform_0(%arg0: i32) -> (i32, i32) {
    %c0_i32 = arith.constant 0 : i32
    %c0_i32_0 = arith.constant 0 : i32
    return %arg0, %c0_i32 : i32, i32
  }
  func.func @transform_1(%arg0: i32) -> (i32, i32) {
    %c0_i32 = arith.constant 0 : i32
    %c0_i32_0 = arith.constant 0 : i32
    %c0_i32_1 = arith.constant 0 : i32
    return %c0_i32, %c0_i32_0 : i32, i32
  }
  func.func @transform_2(%arg0: i32) -> (i32, i32) {
    %c0_i32 = arith.constant 0 : i32
    %c0_i32_0 = arith.constant 0 : i32
    %c0_i32_1 = arith.constant 0 : i32
    return %c0_i32, %c0_i32_0 : i32, i32
  }
  func.func @transform_3(%arg0: i32) -> (i32, i32) {
    %c0_i32 = arith.constant 0 : i32
    %c0_i32_0 = arith.constant 0 : i32
    %c0_i32_1 = arith.constant 0 : i32
    return %c0_i32, %c0_i32_0 : i32, i32
  }
  func.func @transform_4(%arg0: i32) -> (i32, i32) {
    %c0_i32 = arith.constant 0 : i32
    %c0_i32_0 = arith.constant 0 : i32
    %c0_i32_1 = arith.constant 0 : i32
    return %c0_i32, %c0_i32_0 : i32, i32
  }
  func.func @transform_5(%arg0: i32) -> (i32, i32) {
    %c0_i32 = arith.constant 0 : i32
    %c0_i32_0 = arith.constant 0 : i32
    %c0_i32_1 = arith.constant 0 : i32
    return %c0_i32, %c0_i32_0 : i32, i32
  }
  func.func @transform_6(%arg0: i32) -> (i32, i32) {
    %c0_i32 = arith.constant 0 : i32
    %c0_i32_0 = arith.constant 0 : i32
    %c0_i32_1 = arith.constant 0 : i32
    return %c0_i32, %c0_i32_0 : i32, i32
  }
  func.func @transform_7(%arg0: i32) -> (i32, i32) {
    %c0_i32 = arith.constant 0 : i32
    %c0_i32_0 = arith.constant 0 : i32
    %c0_i32_1 = arith.constant 0 : i32
    return %c0_i32, %c0_i32_0 : i32, i32
  }
  func.func @transform_8(%arg0: i32) -> (i32, i32) {
    %c0_i32 = arith.constant 0 : i32
    %c0_i32_0 = arith.constant 0 : i32
    %c0_i32_1 = arith.constant 0 : i32
    return %c0_i32, %c0_i32_0 : i32, i32
  }
  func.func @transform_9(%arg0: i32) -> (i32, i32) {
    %c0_i32 = arith.constant 0 : i32
    %c0_i32_0 = arith.constant 0 : i32
    return %arg0, %c0_i32 : i32, i32
  }
}

</mosaic_0001>

<bundles_post_ra>
// kernel: mlp_forward.1
= control target key start
LH: loop header
LB: loop body
LE: loop exit
PB: predicated region body
PF: predicated region fallthrough
CT: control target
= control target key end

     0   :  { %s2335_s0 = inlined_call_operand.vmem [shape: bf16[8,896], index: 0, kind: input, shape index: {}]   ;;  %s2336_s1 = inlined_call_operand.vmem [shape: bf16[896,256], index: 1, kind: input, shape index: {}]   ;;  %s2337_s2 = inlined_call_operand.vmem [shape: f32[1,256], index: 2, kind: input, shape index: {}]   ;;  %s2338_s3 = inlined_call_operand.vmem [shape: bf16[256,128], index: 3, kind: input, shape index: {}]   ;;  %s2339_s4 = inlined_call_operand.vmem [shape: f32[1,128], index: 4, kind: input, shape index: {}]   ;;  %s2340_s5 = inlined_call_operand.vmem [shape: bf16[128,128], index: 5, kind: input, shape index: {}]   ;;  %s2341_s6 = inlined_call_operand.vmem [shape: f32[1,128], index: 6, kind: input, shape index: {}]   ;;  %s2342_s7 = inlined_call_operand.vmem [shape: bf16[128,128], index: 7, kind: input, shape index: {}]   ;;  %s2343_s8 = inlined_call_operand.vmem [shape: f32[1,128], index: 8, kind: input, shape index: {}]   ;;  %s2344_s9 = inlined_call_operand.hbm [shape: f32[8,128], index: 9, kind: output, shape index: {}]  }
   0x1   :  { %v1569_v0 = vld [vmem:[%s2336_s1 + $0x74] ss:$8 sps:$4 sm:$0xff]   ;;  %v1571_v1 = vld [vmem:[%s2336_s1 + $0x70] ss:$8 sps:$4 sm:$0xff]   ;;  %v1575_v4 = vld [vmem:[%s2336_s1 + $0x64] ss:$8 sps:$4 sm:$0xff]  }
   0x2   :  { %747 = vmatprep.subr.bf16.mxu0 %v1569_v0  ;;  %v1572_v2 = vld [vmem:[%s2336_s1 + $0x174] ss:$8 sps:$4 sm:$0xff]   ;;  %v1574_v3 = vld [vmem:[%s2336_s1 + $0x170] ss:$8 sps:$4 sm:$0xff]   ;;  %v1577_v5 = vld [vmem:[%s2336_s1 + $0x60] ss:$8 sps:$4 sm:$0xff]  }
   0x3   :  { %748 = vmatpush1.bf16.msra.mxu0 %v1571_v1  ;;  %788 = vmatprep.subr.bf16.mxu1 %v1572_v2  ;;  %v1578_v6 = vld [vmem:[%s2336_s1 + $0x164] ss:$8 sps:$4 sm:$0xff]   ;;  %v1580_v7 = vld [vmem:[%s2336_s1 + $0x160] ss:$8 sps:$4 sm:$0xff]   ;;  %v1581_v8 = vld [vmem:[%s2336_s1 + $0x54] ss:$8 sps:$4 sm:$0xff]  }
   0x4   :  { %789 = vmatpush1.bf16.msra.mxu1 %v1574_v3  ;;  %749 = vmatprep.subr.bf16.mxu0 %v1575_v4  ;;  %v1583_v9 = vld [vmem:[%s2336_s1 + $0x50] ss:$8 sps:$4 sm:$0xff]   ;;  %v1584_v10 = vld [vmem:[%s2336_s1 + $0x154] ss:$8 sps:$4 sm:$0xff]   ;;  %v1587_v11 = vld [vmem:[%s2336_s1 + $0x44] ss:$8 sps:$4 sm:$0xff]  }
   0x5   :  { %790 = vmatprep.subr.bf16.mxu1 %v1578_v6  ;;  %v1586_v12 = vld [vmem:[%s2336_s1 + $0x150] ss:$8 sps:$4 sm:$0xff]   ;;  %v1590_v13 = vld [vmem:[%s2336_s1 + $0x144] ss:$8 sps:$4 sm:$0xff]   ;;  %v1589_v14 = vld [vmem:[%s2336_s1 + $0x40] ss:$8 sps:$4 sm:$0xff]  }
   0x6   :  { %v1593_v15 = vld [vmem:[%s2336_s1 + $0x34] ss:$8 sps:$4 sm:$0xff]   ;;  %v1592_v16 = vld [vmem:[%s2336_s1 + $0x140] ss:$8 sps:$4 sm:$0xff]   ;;  %v1595_v18 = vld [vmem:[%s2336_s1 + $0x30] ss:$8 sps:$4 sm:$0xff]  }
   0x7   :  { %750 = vmatpush1.bf16.msra.mxu0 %v1577_v5  ;;  %v1596_v17 = vld [vmem:[%s2336_s1 + $0x134] ss:$8 sps:$4 sm:$0xff]   ;;  %v1599_v19 = vld [vmem:[%s2336_s1 + $0x24] ss:$8 sps:$4 sm:$0xff]   ;;  %v1598_v20 = vld [vmem:[%s2336_s1 + $0x130] ss:$8 sps:$4 sm:$0xff]  }
   0x8   :  { %751 = vmatprep.subr.bf16.mxu0 %v1581_v8  ;;  %791 = vmatpush1.bf16.msra.mxu1 %v1580_v7  ;;  %v1602_v21 = vld [vmem:[%s2336_s1 + $0x124] ss:$8 sps:$4 sm:$0xff]   ;;  %v1601_v22 = vld [vmem:[%s2336_s1 + $0x20] ss:$8 sps:$4 sm:$0xff]   ;;  %v1605_v23 = vld [vmem:[%s2336_s1 + $0x14] ss:$8 sps:$4 sm:$0xff]  }
   0x9   :  { %792 = vmatprep.subr.bf16.mxu1 %v1584_v10  ;;  %v1604_v24 = vld [vmem:[%s2336_s1 + $0x120] ss:$8 sps:$4 sm:$0xff]   ;;  %v1608_v25 = vld [vmem:[%s2336_s1 + $0x114] ss:$8 sps:$4 sm:$0xff]   ;;  %v1607_v26 = vld [vmem:[%s2336_s1 + $0x10] ss:$8 sps:$4 sm:$0xff]  }
   0xa   :  { %v1611_v27 = vld [vmem:[%s2336_s1 + $0x4] ss:$8 sps:$4 sm:$0xff]   ;;  %v1610_v28 = vld [vmem:[%s2336_s1 + $0x110] ss:$8 sps:$4 sm:$0xff]   ;;  %v1613_v30 = vld [vmem:[%s2336_s1] ss:$8 sps:$4 sm:$0xff]  }
   0xb   :  { %752 = vmatpush1.bf16.msra.mxu0 %v1583_v9  ;;  %v1614_v29 = vld [vmem:[%s2336_s1 + $0x104] ss:$8 sps:$4 sm:$0xff]   ;;  %v1617_v31 = vld [vmem:[%s2336_s1 + $0xf4] ss:$8 sps:$4 sm:$0xff]   ;;  %v1616_v32 = vld [vmem:[%s2336_s1 + $0x100] ss:$8 sps:$4 sm:$0xff]  }
   0xc   :  { %753 = vmatprep.subr.bf16.mxu0 %v1587_v11  ;;  %793 = vmatpush1.bf16.msra.mxu1 %v1586_v12  ;;  %v1620_v33 = vld [vmem:[%s2336_s1 + $0x1f4] ss:$8 sps:$4 sm:$0xff]   ;;  %v1619_v34 = vld [vmem:[%s2336_s1 + $0xf0] ss:$8 sps:$4 sm:$0xff]   ;;  %v1623_v35 = vld [vmem:[%s2336_s1 + $0xe4] ss:$8 sps:$4 sm:$0xff]  }
   0xd   :  { %794 = vmatprep.subr.bf16.mxu1 %v1590_v13  ;;  %v1622_v36 = vld [vmem:[%s2336_s1 + $0x1f0] ss:$8 sps:$4 sm:$0xff]   ;;  %v1626_v37 = vld [vmem:[%s2336_s1 + $0x1e4] ss:$8 sps:$4 sm:$0xff]   ;;  %v1625_v38 = vld [vmem:[%s2336_s1 + $0xe0] ss:$8 sps:$4 sm:$0xff]  }
   0xe   :  { %v1629_v39 = vld [vmem:[%s2336_s1 + $0xd4] ss:$8 sps:$4 sm:$0xff]   ;;  %v1628_v40 = vld [vmem:[%s2336_s1 + $0x1e0] ss:$8 sps:$4 sm:$0xff]   ;;  %v1631_v42 = vld [vmem:[%s2336_s1 + $0xd0] ss:$8 sps:$4 sm:$0xff]  }
   0xf   :  { %754 = vmatpush1.bf16.msra.mxu0 %v1589_v14  ;;  %v1632_v41 = vld [vmem:[%s2336_s1 + $0x1d4] ss:$8 sps:$4 sm:$0xff]   ;;  %v1635_v43 = vld [vmem:[%s2336_s1 + $0xc4] ss:$8 sps:$4 sm:$0xff]   ;;  %v1634_v44 = vld [vmem:[%s2336_s1 + $0x1d0] ss:$8 sps:$4 sm:$0xff]  }
  0x10   :  { %755 = vmatprep.subr.bf16.mxu0 %v1593_v15  ;;  %795 = vmatpush1.bf16.msra.mxu1 %v1592_v16  ;;  %v1638_v45 = vld [vmem:[%s2336_s1 + $0x1c4] ss:$8 sps:$4 sm:$0xff]   ;;  %v1637_v47 = vld [vmem:[%s2336_s1 + $0xc0] ss:$8 sps:$4 sm:$0xff]   ;;  %v1641_v49 = vld [vmem:[%s2336_s1 + $0xb4] ss:$8 sps:$4 sm:$0xff]  }
  0x11   :  { %796 = vmatprep.subr.bf16.mxu1 %v1596_v17  ;;  %v34_v46 = vld [vmem:[%s2335_s0] sm:$0xff]  ;;  %v35_v50 = vld [vmem:[%s2335_s0 + $0x8] sm:$0xff]  ;;  %v1644_v53 = vld [vmem:[%s2336_s1 + $0x1b4] ss:$8 sps:$4 sm:$0xff]   ;;  %v1798_v15 = vmov 0  }
  0x12   :  { %v1332_v48 = vcombine.high %v34_v46, %v34_v46  ;;  %v1640_v51 = vld [vmem:[%s2336_s1 + $0x1c0] ss:$8 sps:$4 sm:$0xff]   ;;  %v1334_v52 = vcombine.high %v35_v50, %v35_v50  ;;  %v1643_v54 = vld [vmem:[%s2336_s1 + $0xb0] ss:$8 sps:$4 sm:$0xff]   ;;  %v1647_v55 = vld [vmem:[%s2336_s1 + $0xa4] ss:$8 sps:$4 sm:$0xff]   ;;  %v1331_v5 = vcombine.low %v34_v46, %v34_v46  ;;  %v1333_v8 = vcombine.low %v35_v50, %v35_v50 }
  0x13   :  { %756 = vmatpush1.bf16.msra.mxu0 %v1595_v18  ;;  %v1646_v56 = vld [vmem:[%s2336_s1 + $0x1b0] ss:$8 sps:$4 sm:$0xff]   ;;  %v1650_v57 = vld [vmem:[%s2336_s1 + $0x1a4] ss:$8 sps:$4 sm:$0xff]   ;;  %v1649_v58 = vld [vmem:[%s2336_s1 + $0xa0] ss:$8 sps:$4 sm:$0xff]  }
  0x14   :  { %757 = vmatprep.subr.bf16.mxu0 %v1599_v19  ;;  %797 = vmatpush1.bf16.msra.mxu1 %v1598_v20  ;;  %v1653_v59 = vld [vmem:[%s2336_s1 + $0x94] ss:$8 sps:$4 sm:$0xff]   ;;  %v1652_v60 = vld [vmem:[%s2336_s1 + $0x1a0] ss:$8 sps:$4 sm:$0xff]   ;;  %v1655_v62 = vld [vmem:[%s2336_s1 + $0x90] ss:$8 sps:$4 sm:$0xff]  }
  0x15   :  { %798 = vmatprep.subr.bf16.mxu1 %v1602_v21  ;;  %779 = vmatprep.mubr.bf16.mxu0 %v1332_v48  ;;  %v1656_v61 = vld [vmem:[%s2336_s1 + $0x194] ss:$8 sps:$4 sm:$0xff]   ;;  %v1659_v63 = vld [vmem:[%s2336_s1 + $0x84] ss:$8 sps:$4 sm:$0xff]   ;;  %v1658_v0 = vld [vmem:[%s2336_s1 + $0x190] ss:$8 sps:$4 sm:$0xff]  }
  0x16   :  { %820 = vmatprep.mubr.bf16.mxu1 %v1334_v52  ;;  %v1662_v1 = vld [vmem:[%s2336_s1 + $0x184] ss:$8 sps:$4 sm:$0xff]   ;;  %v1661_v2 = vld [vmem:[%s2336_s1 + $0x80] ss:$8 sps:$4 sm:$0xff]   ;;  %v1669_v3 = vld [vmem:[%s2336_s1 + $0x274] ss:$8 sps:$4 sm:$0xff]  }
  0x17   :  { %758 = vmatpush1.bf16.msra.mxu0 %v1601_v22  ;;  %v1666_v4 = vld [vmem:[%s2336_s1 + $0x180] ss:$8 sps:$4 sm:$0xff]   ;;  %v1695_v6 = vld [vmem:[%s2336_s1 + $0x374] ss:$8 sps:$4 sm:$0xff]   ;;  %v1667_v7 = vld [vmem:[%s2336_s1 + $0x270] ss:$8 sps:$4 sm:$0xff]  }
  0x18   :  { %759 = vmatprep.subr.bf16.mxu0 %v1605_v23  ;;  %799 = vmatpush1.bf16.msra.mxu1 %v1604_v24  ;;  %v1674_v9 = vld [vmem:[%s2336_s1 + $0x264] ss:$8 sps:$4 sm:$0xff]   ;;  %v1693_v10 = vld [vmem:[%s2336_s1 + $0x370] ss:$8 sps:$4 sm:$0xff]   ;;  %v1672_v12 = vld [vmem:[%s2336_s1 + $0x260] ss:$8 sps:$4 sm:$0xff]  }
  0x19   :  { %800 = vmatprep.subr.bf16.mxu1 %v1608_v25  ;;  %v1701_v11 = vld [vmem:[%s2336_s1 + $0x364] ss:$8 sps:$4 sm:$0xff]   ;;  %v1677_v13 = vld [vmem:[%s2336_s1 + $0x254] ss:$8 sps:$4 sm:$0xff]   ;;  %v1699_v14 = vld [vmem:[%s2336_s1 + $0x360] ss:$8 sps:$4 sm:$0xff]  }
  0x1a   :  { %v1707_v16 = vld [vmem:[%s2336_s1 + $0x354] ss:$8 sps:$4 sm:$0xff]   ;;  %v1675_v17 = vld [vmem:[%s2336_s1 + $0x250] ss:$8 sps:$4 sm:$0xff]   ;;  %v1680_v18 = vld [vmem:[%s2336_s1 + $0x244] ss:$8 sps:$4 sm:$0xff]  }
  0x1b   :  { %760 = vmatpush1.bf16.msra.mxu0 %v1607_v26  ;;  %v1678_v19 = vld [vmem:[%s2336_s1 + $0x240] ss:$8 sps:$4 sm:$0xff]   ;;  %v1705_v20 = vld [vmem:[%s2336_s1 + $0x350] ss:$8 sps:$4 sm:$0xff]   ;;  %v1713_v21 = vld [vmem:[%s2336_s1 + $0x344] ss:$8 sps:$4 sm:$0xff]  }
  0x1c   :  { %761 = vmatprep.subr.bf16.mxu0 %v1611_v27  ;;  %801 = vmatpush1.bf16.msra.mxu1 %v1610_v28  ;;  %v1683_v22 = vld [vmem:[%s2336_s1 + $0x234] ss:$8 sps:$4 sm:$0xff]   ;;  %v1711_v23 = vld [vmem:[%s2336_s1 + $0x340] ss:$8 sps:$4 sm:$0xff]   ;;  %v1681_v26 = vld [vmem:[%s2336_s1 + $0x230] ss:$8 sps:$4 sm:$0xff]  }
  0x1d   :  { %802 = vmatprep.subr.bf16.mxu1 %v1614_v29  ;;  %v1719_v24 = vld [vmem:[%s2336_s1 + $0x334] ss:$8 sps:$4 sm:$0xff]   ;;  %v1686_v28 = vld [vmem:[%s2336_s1 + $0x224] ss:$8 sps:$4 sm:$0xff]   ;;  %v1717_v29 = vld [vmem:[%s2336_s1 + $0x330] ss:$8 sps:$4 sm:$0xff]  }
  0x1e   :  { %v2107_v25 = vld [vmem:[%s2335_s0 + $0x10] sm:$0xff] }
  0x1f   :  { %762 = vmatpush1.bf16.msra.mxu0 %v1613_v30  ;;  %v1336_v27 = vcombine.high %v2107_v25, %v2107_v25  ;;  %v1725_v30 = vld [vmem:[%s2336_s1 + $0x324] ss:$8 sps:$4 sm:$0xff]  }
  0x20   :  { %763 = vmatprep.subr.bf16.mxu0 %v1617_v31  ;;  %803 = vmatpush1.bf16.msra.mxu1 %v1616_v32  ;;  %v1684_v31 = vld [vmem:[%s2336_s1 + $0x220] ss:$8 sps:$4 sm:$0xff]   ;;  %v1689_v32 = vld [vmem:[%s2336_s1 + $0x214] ss:$8 sps:$4 sm:$0xff]  }
  0x21   :  { %804 = vmatprep.subr.bf16.mxu1 %v1620_v33  ;;  %v1723_v33 = vld [vmem:[%s2336_s1 + $0x320] ss:$8 sps:$4 sm:$0xff]  }
  0x23   :  { %764 = vmatpush2.bf16.msra.mxu0 %v1619_v34  ;;  %v1731_v34 = vld [vmem:[%s2336_s1 + $0x314] ss:$8 sps:$4 sm:$0xff]  }
  0x24   :  { %765 = vmatprep.subr.bf16.mxu0 %v1623_v35  ;;  %805 = vmatpush2.bf16.msra.mxu1 %v1622_v36  ;;  %v1687_v35 = vld [vmem:[%s2336_s1 + $0x210] ss:$8 sps:$4 sm:$0xff]   ;;  %v1692_v36 = vld [vmem:[%s2336_s1 + $0x204] ss:$8 sps:$4 sm:$0xff]  }
  0x25   :  { %806 = vmatprep.subr.bf16.mxu1 %v1626_v37  ;;  %v1729_v37 = vld [vmem:[%s2336_s1 + $0x310] ss:$8 sps:$4 sm:$0xff]  }
  0x27   :  { %766 = vmatpush2.bf16.msra.mxu0 %v1625_v38  ;;  %v1737_v38 = vld [vmem:[%s2336_s1 + $0x304] ss:$8 sps:$4 sm:$0xff]  }
  0x28   :  { %767 = vmatprep.subr.bf16.mxu0 %v1629_v39  ;;  %807 = vmatpush2.bf16.msra.mxu1 %v1628_v40  ;;  %v1690_v39 = vld [vmem:[%s2336_s1 + $0x200] ss:$8 sps:$4 sm:$0xff]   ;;  %v1698_v40 = vld [vmem:[%s2336_s1 + $0x2f4] ss:$8 sps:$4 sm:$0xff]  }
  0x29   :  { %808 = vmatprep.subr.bf16.mxu1 %v1632_v41  ;;  %v1735_v41 = vld [vmem:[%s2336_s1 + $0x300] ss:$8 sps:$4 sm:$0xff]  }
  0x2b   :  { %768 = vmatpush2.bf16.msra.mxu0 %v1631_v42  ;;  %v1696_v42 = vld [vmem:[%s2336_s1 + $0x2f0] ss:$8 sps:$4 sm:$0xff]  }
  0x2c   :  { %769 = vmatprep.subr.bf16.mxu0 %v1635_v43  ;;  %809 = vmatpush2.bf16.msra.mxu1 %v1634_v44  ;;  %v1704_v43 = vld [vmem:[%s2336_s1 + $0x2e4] ss:$8 sps:$4 sm:$0xff]   ;;  %v1741_v44 = vld [vmem:[%s2335_s0 + $0x18] ss:$0 sps:$4 sm:$0xff]  }
  0x2d   :  { %810 = vmatprep.subr.bf16.mxu1 %v1638_v45 }
  0x2f   :  { %770 = vmatpush2.bf16.msra.mxu0 %v1637_v47 }
  0x30   :  { %771 = vmatprep.subr.bf16.mxu0 %v1641_v49  ;;  %811 = vmatpush2.bf16.msra.mxu1 %v1640_v51 }
  0x31   :  { %812 = vmatprep.subr.bf16.mxu1 %v1644_v53 }
  0x33   :  { %772 = vmatpush2.bf16.msra.mxu0 %v1643_v54 }
  0x34   :  { %773 = vmatprep.subr.bf16.mxu0 %v1647_v55  ;;  %813 = vmatpush2.bf16.msra.mxu1 %v1646_v56 }
  0x35   :  { %814 = vmatprep.subr.bf16.mxu1 %v1650_v57 }
  0x37   :  { %774 = vmatpush2.bf16.msra.mxu0 %v1649_v58 }
  0x38   :  { %775 = vmatprep.subr.bf16.mxu0 %v1653_v59  ;;  %815 = vmatpush2.bf16.msra.mxu1 %v1652_v60 }
  0x39   :  { %816 = vmatprep.subr.bf16.mxu1 %v1656_v61 }
  0x3b   :  { %776 = vmatpush2.bf16.msra.mxu0 %v1655_v62 }
  0x3c   :  { %777 = vmatprep.subr.bf16.mxu0 %v1659_v63  ;;  %817 = vmatpush2.bf16.msra.mxu1 %v1658_v0 }
  0x3d   :  { %818 = vmatprep.subr.bf16.mxu1 %v1662_v1 }
  0x3f   :  { %778 = vmatpush2.bf16.msra.mxu0 %v1661_v2 }
  0x40   :  { %829 = vmatprep.subr.bf16.mxu0 %v1669_v3  ;;  %819 = vmatpush2.bf16.msra.mxu1 %v1666_v4 }
  0x41   :  { %870 = vmatprep.subr.bf16.mxu1 %v1695_v6 }
  0x42   :  { %780 = vmatmul.mubr.bf16.vlgmr.msra.gmra.mxu0 %v1331_v5 }
  0x43   :  { %830 = vmatpush1.bf16.msra.mxu0 %v1667_v7  ;;  %821 = vmatmul.mubr.bf16.vlgmr.msra.gmra.mxu1 %v1333_v8 }
  0x44   :  { %831 = vmatprep.subr.bf16.mxu0 %v1674_v9  ;;  %871 = vmatpush1.bf16.msra.mxu1 %v1693_v10 }
  0x45   :  { %902 = vmatprep.mubr.bf16.mxu1 %v1798_v15  ;;  %872 = vmatprep.subr.bf16.mxu1 %v1701_v11 }
  0x46   :  { %861 = vmatprep.mubr.bf16.mxu0 %v1336_v27 }
  0x47   :  { %832 = vmatpush1.bf16.msra.mxu0 %v1672_v12 }
  0x48   :  { %833 = vmatprep.subr.bf16.mxu0 %v1677_v13  ;;  %873 = vmatpush1.bf16.msra.mxu1 %v1699_v14 }
  0x49   :  { %874 = vmatprep.subr.bf16.mxu1 %v1707_v16 }
  0x4b   :  { %834 = vmatpush1.bf16.msra.mxu0 %v1675_v17 }
  0x4c   :  { %835 = vmatprep.subr.bf16.mxu0 %v1680_v18  ;;  %875 = vmatpush1.bf16.msra.mxu1 %v1705_v20 }
  0x4d   :  { %876 = vmatprep.subr.bf16.mxu1 %v1713_v21 }
  0x4f   :  { %836 = vmatpush1.bf16.msra.mxu0 %v1678_v19 }
  0x50   :  { %837 = vmatprep.subr.bf16.mxu0 %v1683_v22  ;;  %877 = vmatpush1.bf16.msra.mxu1 %v1711_v23 }
  0x51   :  { %878 = vmatprep.subr.bf16.mxu1 %v1719_v24 }
  0x53   :  { %838 = vmatpush1.bf16.msra.mxu0 %v1681_v26 }
  0x54   :  { %839 = vmatprep.subr.bf16.mxu0 %v1686_v28  ;;  %879 = vmatpush1.bf16.msra.mxu1 %v1717_v29 }
  0x55   :  { %880 = vmatprep.subr.bf16.mxu1 %v1725_v30 }
  0x57   :  { %840 = vmatpush1.bf16.msra.mxu0 %v1684_v31 }
  0x58   :  { %841 = vmatprep.subr.bf16.mxu0 %v1689_v32  ;;  %881 = vmatpush1.bf16.msra.mxu1 %v1723_v33 }
  0x59   :  { %882 = vmatprep.subr.bf16.mxu1 %v1731_v34 }
  0x5b   :  { %842 = vmatpush1.bf16.msra.mxu0 %v1687_v35 }
  0x5c   :  { %843 = vmatprep.subr.bf16.mxu0 %v1692_v36  ;;  %883 = vmatpush1.bf16.msra.mxu1 %v1729_v37 }
  0x5d   :  { %884 = vmatprep.subr.bf16.mxu1 %v1737_v38 }
  0x5f   :  { %844 = vmatpush1.bf16.msra.mxu0 %v1690_v39 }
  0x60   :  { %845 = vmatprep.subr.bf16.mxu0 %v1698_v40  ;;  %885 = vmatpush1.bf16.msra.mxu1 %v1735_v41 }
  0x61   :  { %14 = vsyncpa [#allocation3], 0  ;;  %v1702_v45 = vld [vmem:[%s2336_s1 + $0x2e0] ss:$8 sps:$4 sm:$0xff]   ;;  %v1710_v46 = vld [vmem:[%s2336_s1 + $0x2d4] ss:$8 sps:$4 sm:$0xff]   ;;  %v1335_v58 = vcombine.low %v2107_v25, %v2107_v25  ;;  %v152_v29 = vlaneseq }
  0x62   :  { %v1708_v47 = vld [vmem:[%s2336_s1 + $0x2d0] ss:$8 sps:$4 sm:$0xff]   ;;  %v1716_v48 = vld [vmem:[%s2336_s1 + $0x2c4] ss:$8 sps:$4 sm:$0xff]   ;;  %v1714_v49 = vld [vmem:[%s2336_s1 + $0x2c0] ss:$8 sps:$4 sm:$0xff]  }
  0x63   :  { %846 = vmatpush2.bf16.msra.mxu0 %v1696_v42  ;;  %903 = vmatmul.mubr.bf16.vlgmr.msra.gmra.mxu1 %v1741_v44  ;;  %v1722_v50 = vld [vmem:[%s2336_s1 + $0x2b4] ss:$8 sps:$4 sm:$0xff]   ;;  %v1720_v51 = vld [vmem:[%s2336_s1 + $0x2b0] ss:$8 sps:$4 sm:$0xff]   ;;  %v1728_v52 = vld [vmem:[%s2336_s1 + $0x2a4] ss:$8 sps:$4 sm:$0xff]  }
  0x64   :  { %847 = vmatprep.subr.bf16.mxu0 %v1704_v43  ;;  %v1726_v53 = vld [vmem:[%s2336_s1 + $0x2a0] ss:$8 sps:$4 sm:$0xff]   ;;  %v1734_v54 = vld [vmem:[%s2336_s1 + $0x294] ss:$8 sps:$4 sm:$0xff]   ;;  %v1732_v55 = vld [vmem:[%s2336_s1 + $0x290] ss:$8 sps:$4 sm:$0xff]  }
  0x65   :  { %v1740_v56 = vld [vmem:[%s2336_s1 + $0x284] ss:$8 sps:$4 sm:$0xff]   ;;  %v1738_v57 = vld [vmem:[%s2336_s1 + $0x280] ss:$8 sps:$4 sm:$0xff]   ;;  %v1744_v59 = vld [vmem:[%s2338_s3 + $0x78] sm:$0xff]   ;;  %v1799_v12 = vmov 0.0  }
  0x66   :  { %v1745_v60 = vld [vmem:[%s2338_s3 + $0x38] sm:$0xff]   ;;  %v1746_v61 = vld [vmem:[%s2338_s3 + $0x70] sm:$0xff]   ;;  %1485 = vmatprep.subr.bf16.mxu1 %v1744_v59  ;;  %v1748_v63 = vld [vmem:[%s2338_s3 + $0x68] sm:$0xff]   ;;  %v153_v30 = vshrl.u32 %v152_v29, 7  ;;  %vm1800_vm0 = vmmov 0   ;;  %s1801_s27 = smov [#allocation2]  }
  0x67   :  { %848 = vmatpush2.bf16.msra.mxu0 %v1702_v45  ;;  %1486 = vmatpush3.bf16.msra.mxu1 %v1745_v60  ;;  %v1747_v62 = vld [vmem:[%s2338_s3 + $0x30] sm:$0xff]   ;;  %v1749_v0 = vld [vmem:[%s2338_s3 + $0x28] sm:$0xff]   ;;  %v1750_v1 = vld [vmem:[%s2338_s3 + $0x60] sm:$0xff]   ;;  %s1323_s28 = sshll.u32 %s1801_s27, 4  ;;  %s1324_s28 = int_to_ptr.vmem [resolvable:$true] %s1323_s28 }
  0x68   :  { %849 = vmatprep.subr.bf16.mxu0 %v1710_v46  ;;  %1487 = vmatprep.subr.bf16.mxu1 %v1746_v61  ;;  %v1751_v2 = vld [vmem:[%s2338_s3 + $0x20] sm:$0xff]   ;;  %v1752_v3 = vld [vmem:[%s2338_s3 + $0x58] sm:$0xff]   ;;  %v1754_v5 = vld [vmem:[%s2338_s3 + $0x50] sm:$0xff]   ;;  %v154_v31 = vsub.s32 0, %v153_v30  ;;  %v158_v33 = vsub.s32 1, %v153_v30  ;;  %p1781_p1 = scmp.lt.s32.totalorder %s1324_s28, %s1324_s28 }
  0x69   :  { %v1753_v4 = vld [vmem:[%s2338_s3 + $0x18] sm:$0xff]   ;;  %v1755_v6 = vld [vmem:[%s2338_s3 + $0x10] sm:$0xff]   ;;  %v1756_v7 = vld [vmem:[%s2338_s3 + $0x48] sm:$0xff]  }
  0x6a   :  { %v1757_v8 = vld [vmem:[%s2338_s3 + $0x8] sm:$0xff]   ;;  %v1758_v9 = vld [vmem:[%s2338_s3 + $0x40] sm:$0xff]   ;;  %v1760_v11 = vld [vmem:[%s2340_s5 + $0x38] sm:$0xff]  }
  0x6b   :  { %850 = vmatpush2.bf16.msra.mxu0 %v1708_v47  ;;  %1488 = vmatpush3.bf16.msra.mxu1 %v1747_v62  ;;  %v1759_v10 = vld [vmem:[%s2338_s3] sm:$0xff]   ;;  %v1761_v13 = vld [vmem:[%s2340_s5 + $0x30] sm:$0xff]   ;;  %v1762_v14 = vld [vmem:[%s2340_s5 + $0x28] sm:$0xff]  }
  0x6c   :  { %851 = vmatprep.subr.bf16.mxu0 %v1716_v48  ;;  %1489 = vmatprep.subr.bf16.mxu1 %v1748_v63  ;;  %v1763_v15 = vld [vmem:[%s2340_s5 + $0x20] sm:$0xff]   ;;  %v1764_v16 = vld [vmem:[%s2340_s5 + $0x18] sm:$0xff]   ;;  %v1773_v60 = vld [vmem:[%s2342_s7 + $0x10] sm:$0xff]  }
  0x6d   :  { %v150_v32 = vld [vmem:[%s2337_s2] sm:$0x3]  ;;  %v1772_v59 = vld [vmem:[%s2342_s7 + $0x18] sm:$0xff]  }
  0x6e   :  { %v155_v34 = vrot.slane %v150_v32, %v154_v31  ;;  %v159_v35 = vrot.slane %v150_v32, %v158_v33  ;;  %v1450_v62 = vld [vmem:[%s2339_s4] ss:$0 sm:$0xff] }
  0x6f   :  { %852 = vmatpush2.bf16.msra.mxu0 %v1714_v49  ;;  %1490 = vmatpush3.bf16.msra.mxu1 %v1749_v0 }
  0x70   :  { %853 = vmatprep.subr.bf16.mxu0 %v1722_v50  ;;  %1491 = vmatprep.subr.bf16.mxu1 %v1750_v1 }
  0x73   :  { %854 = vmatpush2.bf16.msra.mxu0 %v1720_v51  ;;  %1492 = vmatpush3.bf16.msra.mxu1 %v1751_v2 }
  0x74   :  { %855 = vmatprep.subr.bf16.mxu0 %v1728_v52  ;;  %1493 = vmatprep.subr.bf16.mxu1 %v1752_v3  ;;  %v1765_v52 = vld [vmem:[%s2340_s5 + $0x10] sm:$0xff]  }
  0x77   :  { %856 = vmatpush2.bf16.msra.mxu0 %v1726_v53  ;;  %1494 = vmatpush3.bf16.msra.mxu1 %v1753_v4  ;;  %v1766_v53 = vld [vmem:[%s2340_s5 + $0x8] sm:$0xff]  }
  0x78   :  { %857 = vmatprep.subr.bf16.mxu0 %v1734_v54  ;;  %1495 = vmatprep.subr.bf16.mxu1 %v1754_v5  ;;  %v1767_v54 = vld [vmem:[%s2340_s5] sm:$0xff]  }
  0x7b   :  { %858 = vmatpush2.bf16.msra.mxu0 %v1732_v55  ;;  %1496 = vmatpush3.bf16.msra.mxu1 %v1755_v6  ;;  %v1768_v55 = vld [vmem:[%s2342_s7 + $0x38] sm:$0xff]   ;;  %v1774_v6 = vld [vmem:[%s2342_s7 + $0x8] sm:$0xff]  }
  0x7c   :  { %859 = vmatprep.subr.bf16.mxu0 %v1740_v56  ;;  %1497 = vmatprep.subr.bf16.mxu1 %v1756_v7  ;;  %v1769_v56 = vld [vmem:[%s2342_s7 + $0x30] sm:$0xff]   ;;  %v1775_v7 = vld [vmem:[%s2342_s7] sm:$0xff]  }
  0x7f   :  { %860 = vmatpush2.bf16.msra.mxu0 %v1738_v57  ;;  %1498 = vmatpush3.bf16.msra.mxu1 %v1757_v8  ;;  %v1770_v57 = vld [vmem:[%s2342_s7 + $0x28] sm:$0xff]   ;;  %v1467_v8 = vld [vmem:[%s2341_s6] ss:$0 sm:$0xff]  ;;  %s1776_s6 = scalar_lea.vmem %s1324_s28, 128 }
  0x80   :  { %1499 = vmatprep.subr.bf16.mxu1 %v1758_v9  ;;  %1525 = vmatprep.subr.bf16.mxu0 %v1799_v12  ;;  %p1777_p0 = scmp.ne.s32.totalorder %s1324_s28, %s1776_s6  ;;  %p1782_p2 = scmp.lt.s32.totalorder %s1776_s6, %s1776_s6 }
  0x82   :  { %862 = vmatmul.mubr.bf16.vlgmr.msra.gmra.mxu0 %v1335_v58  ;;  %v1771_v58 = vld [vmem:[%s2342_s7 + $0x20] sm:$0xff]   ;;  %p1783_p3 = por %p1782_p2, %p1781_p1 }
  0x83   :  { %1500 = vmatpush3.bf16.msra.mxu1 %v1759_v10  ;;  %1526 = vmatpush3.bf16.msra.mxu0 %v1760_v11 }
  0x84   :  { %1545 = vmatprep.subr.bf16.mxu1 %v1799_v12  ;;  %1527 = vmatprep.subr.bf16.mxu0 %v1799_v12  ;;  %p1784_p4 = pnand %p1783_p3, %p1777_p0 }
  0x85   :  { %1541 = vmatprep.mubr.msk.bf16.mxu0 %vm1800_vm0, %v1799_v12 }
  0x87   :  { %1528 = vmatpush3.bf16.msra.mxu0 %v1761_v13 }
  0x88   :  { %1529 = vmatprep.subr.bf16.mxu0 %v1799_v12 }
  0x8b   :  { %1530 = vmatpush3.bf16.msra.mxu0 %v1762_v14 }
  0x8c   :  { %1531 = vmatprep.subr.bf16.mxu0 %v1799_v12 }
  0x8f   :  { %1532 = vmatpush3.bf16.msra.mxu0 %v1763_v15 }
  0x90   :  { %1533 = vmatprep.subr.bf16.mxu0 %v1799_v12 }
  0x93   :  { %1534 = vmatpush3.bf16.msra.mxu0 %v1764_v16 }
  0x94   :  { %1535 = vmatprep.subr.bf16.mxu0 %v1799_v12 }
  0x97   :  { %1536 = vmatpush3.bf16.msra.mxu0 %v1765_v52 }
  0x98   :  { %1537 = vmatprep.subr.bf16.mxu0 %v1799_v12 }
  0x9b   :  { %1538 = vmatpush3.bf16.msra.mxu0 %v1766_v53 }
  0x9c   :  { %1539 = vmatprep.subr.bf16.mxu0 %v1799_v12 }
  0x9f   :  { %1540 = vmatpush3.bf16.msra.mxu0 %v1767_v54 }
 0x102   :  { %v781_v17 = vpop.f32.mrf.mxu0 }
 0x103   :  { %v822_v19 = vpop.f32.mrf.mxu1  ;;  %v782_v36 = vadd.f32 %v781_v17, %v155_v34 }
 0x104   :  { %v783_v18 = vpop.f32.mrf.mxu0 }
 0x105   :  { %v824_v21 = vpop.f32.mrf.mxu1  ;;  %v784_v37 = vadd.f32 %v783_v18, %v159_v35  ;;  %v823_v38 = vadd.f32 %v822_v19, %v782_v36 }
 0x106   :  { %v785_v20 = vpop.f32.mrf.mxu0 }
 0x107   :  { %v826_v23 = vpop.f32.mrf.mxu1  ;;  %v825_v40 = vadd.f32 %v824_v21, %v784_v37 }
 0x108   :  { %v786_v22 = vpop.f32.mrf.mxu0 }
 0x109   :  { %v827_v24 = vpop.f32.mrf.mxu1 }
 0x123   :  { %v904_v25 = vpop.f32.mrf.mxu1 }
 0x125   :  { %v906_v26 = vpop.f32.mrf.mxu1 }
 0x127   :  { %v908_v27 = vpop.f32.mrf.mxu1 }
 0x129   :  { %v909_v28 = vpop.f32.mrf.mxu1 }
 0x142   :  { %v863_v39 = vpop.f32.mrf.mxu0 }
 0x143   :  { %v864_v41 = vadd.f32 %v863_v39, %v823_v38 }
 0x144   :  { %v865_v42 = vpop.f32.mrf.mxu0 }
 0x145   :  { %v905_v43 = vadd.f32 %v904_v25, %v864_v41  ;;  %v866_v44 = vadd.f32 %v865_v42, %v825_v40 }
 0x146   :  { %v867_v45 = vpop.f32.mrf.mxu0 }
 0x147   :  { %v907_v46 = vadd.f32 %v906_v26, %v866_v44  ;;  %v911_v47 = vmax.f32 %v905_v43, 0.0 }
 0x148   :  { %v868_v48 = vpop.f32.mrf.mxu0 }
 0x149   :  { %v912_v49 = vmax.f32 %v907_v46, 0.0  ;;  %v913_v51 = vpack.c.bf16 %v911_v47, %v911_v47 }
 0x14b   :  { %v914_v50 = vpack.c.bf16 %v912_v49, %v912_v49 }
 0x14d   :  { %1082 = vmatprep.mubr.bf16.mxu1 %v914_v50 }
 0x14e   :  { %1083 = vmatmul.mubr.bf16.vlgmr.msra.gmra.mxu1 %v913_v51 }
 0x14f   :  { %1561 = vmatprep.mubr.msk.bf16.mxu1 %vm1800_vm0, %v1799_v12  ;;  %1546 = vmatpush3.bf16.msra.mxu1 %v1768_v55 }
 0x150   :  { %1547 = vmatprep.subr.bf16.mxu1 %v1799_v12 }
 0x153   :  { %1548 = vmatpush3.bf16.msra.mxu1 %v1769_v56 }
 0x154   :  { %1549 = vmatprep.subr.bf16.mxu1 %v1799_v12 }
 0x157   :  { %1550 = vmatpush3.bf16.msra.mxu1 %v1770_v57 }
 0x158   :  { %1551 = vmatprep.subr.bf16.mxu1 %v1799_v12 }
 0x15b   :  { %1552 = vmatpush3.bf16.msra.mxu1 %v1771_v58 }
 0x15c   :  { %1553 = vmatprep.subr.bf16.mxu1 %v1799_v12 }
 0x15f   :  { %1554 = vmatpush3.bf16.msra.mxu1 %v1772_v59 }
 0x160   :  { %1555 = vmatprep.subr.bf16.mxu1 %v1799_v12 }
 0x163   :  { %1556 = vmatpush3.bf16.msra.mxu1 %v1773_v60 }
 0x164   :  { %1557 = vmatprep.subr.bf16.mxu1 %v1799_v12 }
 0x167   :  { %1558 = vmatpush3.bf16.msra.mxu1 %v1774_v6 }
 0x168   :  { %1559 = vmatprep.subr.bf16.mxu1 %v1799_v12  ;;  %v1476_v12 = vld [vmem:[%s2343_s8] ss:$0 sm:$0xff] }
 0x16b   :  { %1560 = vmatpush3.bf16.msra.mxu1 %v1775_v7 }
 0x20e   :  { %v1501_v61 = vpop.f32.mrf.mxu1 }
 0x210   :  { %v1502_v63 = vpop.f32.mrf.mxu1 }
 0x211   :  { %v1503_v0 = vadd.f32 %v1502_v63, %v1501_v61 }
 0x212   :  { %v1504_v1 = vpop.f32.mrf.mxu1 }
 0x213   :  { %v1085_v2 = vadd.f32 %v1503_v0, %v1450_v62 }
 0x214   :  { %v1505_v3 = vpop.f32.mrf.mxu1 }
 0x215   :  { %v1090_v4 = vmax.f32 %v1085_v2, 0.0 }
 0x217   :  { %v1091_v5 = vpack.c.bf16 %v1090_v4, %v1090_v4 }
 0x219   :  { %1542 = vmatmul.mubr.bf16.vlgmr.msra.gmra.mxu0 %v1091_v5 }
 0x2d9   :  { %v1197_v9 = vpop.f32.mrf.mxu0 }
 0x2da   :  { %v1198_v10 = vadd.f32 %v1467_v8, %v1197_v9 }
 0x2db   :  { %v1543_v11 = vpop.f32.mrf.mxu0 }
 0x2dc   :  { %v1203_v13 = vmax.f32 %v1198_v10, 0.0 }
 0x2dd   :  { %v1200_v14 = vpop.f32.mrf.mxu0 }
 0x2de   :  { %v1204_v15 = vpack.c.bf16 %v1203_v13, %v1203_v13 }
 0x2df   :  { %v1544_v16 = vpop.f32.mrf.mxu0 }
 0x2e0   :  { %1562 = vmatmul.mubr.bf16.vlgmr.msra.gmra.mxu1 %v1204_v15 }
 0x3a0   :  { %v1310_v17 = vpop.f32.mrf.mxu1 }
 0x3a1   :  { %v1311_v18 = vadd.f32 %v1476_v12, %v1310_v17 }
 0x3a2   :  { %v1563_v19 = vpop.f32.mrf.mxu1 }
 0x3a3   :  { %1316 = vst [vmem:[#allocation2] sm:$0xff] %v1311_v18 }
 0x3a4   :  { %v1313_v20 = vpop.f32.mrf.mxu1 }
 0x3a5   :  { %1787 = shalt.err (!%p1784_p4)
}
 0x3a6   :  { %1326 = dma.vmem_to_hbm [thread:$0]  %s1324_s28, 128, %s2344_s9, [#allocation3]   ;;  %v1564_v21 = vpop.f32.mrf.mxu1 }
 0x3a7   :  { %1796 = dma.done.wait [#allocation3], 128  }
 0x3a8   :  { %1797 = vsyncadd [#allocation3], 4294967168 }
 0x3a9   :  { %1330 = vsyncpa [#allocation3], 1 }

</bundles_post_ra>
